<compile_context>
chip_gen: v7x
topology: tpu7x:2x2x1
jax: 0.10.0
libtpu: 0.0.40
codegen_flags: <defaults>
</compile_context>

<pallas_src>
import functools

import jax
import jax.numpy as jnp
from jax.experimental import pallas as pl
from jax.experimental.pallas import tpu as pltpu

# Default max lanes per tile. 64K lanes => streamed blocks ~1-1.5 MiB each (C=4) and <~10 MiB of
# f32 temporaries: comfortably inside 32 MiB scoped VMEM on v5e/v6e/v7x while amortizing the
# per-grid-step overhead. Override with tile_n= for sweeps.
_MAX_TILE_N = 64 * 1024


def _round_up(x, m):
    return (x + m - 1) // m * m


def _focal_loss_kernel(logits_ref, tgt_ref, alpha_ref, out_ref, *, n, gamma, scale):
    # logits_ref: (C, TN)  native dtype (classes on sublanes, batch samples on lanes)
    # tgt_ref   : (1, TN)  int32 class indices
    # alpha_ref : (C, 1)   f32 class weights (resident; fetched once)
    # out_ref   : (1, 1)   f32 loss accumulator (resident across the grid; index_map is constant)
    i = pl.program_id(0)
    tn = logits_ref.shape[1]

    @pl.when(i == 0)
    def _init():
        out_ref[...] = jnp.zeros_like(out_ref)

    logits = logits_ref[...].astype(jnp.float32)                 # (C, TN)
    tgt = tgt_ref[...]                                           # (1, TN)
    neg_alpha = -alpha_ref[...]                                  # (C, 1)

    # Numerically stable log-softmax over the class (sublane) axis.
    m = jnp.max(logits, axis=0, keepdims=True)                   # (1, TN)
    shifted = logits - m
    lse = jnp.log(jnp.sum(jnp.exp(shifted), axis=0, keepdims=True))
    logp = shifted - lse                                         # (C, TN)

    # Fused one-hot select + alpha gather: ce = -alpha[y] * log_softmax(x)[y]
    # (no materialized one-hot in HBM, no per-sample weight stream).
    cls = jax.lax.broadcasted_iota(jnp.int32, logp.shape, 0)     # (C, TN)
    sel = cls == tgt                                             # broadcast (1,TN) -> (C,TN)
    ce = jnp.sum(jnp.where(sel, neg_alpha * logp, 0.0), axis=0, keepdims=True)  # (1, TN)

    pt = jnp.exp(-ce)
    q = 1.0 - pt
    if gamma == 2.0:
        focal = q * q * ce                                       # plain VPU square, no pow
    else:
        focal = (q ** gamma) * ce

    # Ragged tail: the last tile may overhang N; its lanes hold garbage (possibly NaN after the
    # math above). Zero them with a lane-index mask BEFORE the reduce (select does not propagate
    # NaN from the unselected operand).
    lane = jax.lax.broadcasted_iota(jnp.int32, focal.shape, 1)   # (1, TN)
    focal = jnp.where(i * tn + lane < n, focal, 0.0)

    # Per-tile scalar partial sum accumulated into the resident (1,1) output block.
    out_ref[...] += jnp.sum(focal, axis=1, keepdims=True)

    @pl.when(i == pl.num_programs(0) - 1)
    def _finalize():
        out_ref[...] = out_ref[...] * scale


def focal_loss(logits, targets, alpha, gamma=2.0, reduction="mean",
               tile_n=None, class_major=False):
    """Focal loss.

    logits : (N, C) float (f32 or bf16) — or (C, N) if class_major=True (skips the transpose pass)
    targets: (N,) int class indices
    alpha  : (C,) float class weights
    """
    assert reduction in ("mean", "sum")

    if class_major:
        c, n = logits.shape
        logits_cn = logits
    else:
        n, c = logits.shape
        # TODO(synk): if the producing matmul can emit class-major (C, N) logits directly, pass
        # class_major=True and skip this extra HBM read+write pass over the largest tensor.
        logits_cn = jnp.transpose(logits)

    # Tile over the batch (lane) axis. Either a full-extent block (always a legal block shape,
    # no tail) or a multiple of 128 smaller than N (legal; last block overhangs and is masked
    # in-kernel — no wrapper jnp.pad / extra HBM pass).
    tn = _round_up(_MAX_TILE_N if tile_n is None else tile_n, 128)
    if tn >= n:
        tn = n
    grid = (pl.cdiv(n, tn),)

    tgt2d = targets.astype(jnp.int32).reshape(1, n)
    alpha2d = alpha.astype(jnp.float32).reshape(c, 1)
    scale = (1.0 / n) if reduction == "mean" else 1.0

    itemsize = jnp.dtype(logits.dtype).itemsize
    cost = pl.CostEstimate(
        flops=int(10 * n * c),                    # softmax + select + focal arithmetic
        transcendentals=int(n * (c + 3)),         # exp per class + log + exp(-ce) (+ pow)
        bytes_accessed=int(n * (c * itemsize + 4) + c * 4 + 4),
    )

    out = pl.pallas_call(
        functools.partial(_focal_loss_kernel, n=n, gamma=float(gamma), scale=scale),
        out_shape=jax.ShapeDtypeStruct((1, 1), jnp.float32),
        grid=grid,
        in_specs=[
            pl.BlockSpec((c, tn), lambda i: (0, i)),   # logits tile (C, TN)
            pl.BlockSpec((1, tn), lambda i: (0, i)),   # targets tile (1, TN)
            pl.BlockSpec((c, 1), lambda i: (0, 0)),    # alpha (resident, fetched once)
        ],
        out_specs=pl.BlockSpec((1, 1), lambda i: (0, 0)),
        compiler_params=pltpu.CompilerParams(
            dimension_semantics=("arbitrary",),        # batch axis is a reduction (accumulator)
            vmem_limit_bytes=32 * 1024 * 1024,         # keeps double-buffering on v5e; safe on v7x
        ),
        cost_estimate=cost,
    )(logits_cn, tgt2d, alpha2d)

    return out[0, 0]


def _reference(logits, targets, alpha, gamma=2.0, reduction="mean"):
    logp = jax.nn.log_softmax(logits.astype(jnp.float32), axis=-1)
    logp_t = jnp.take_along_axis(logp, targets[:, None], axis=-1)[:, 0]
    ce = -alpha.astype(jnp.float32)[targets] * logp_t
    pt = jnp.exp(-ce)
    focal = (1.0 - pt) ** gamma * ce
    return focal.mean() if reduction == "mean" else focal.sum()


if __name__ == "__main__":
    key = jax.random.PRNGKey(0)
    k1, k2, k3, k4 = jax.random.split(key, 4)

    # Small batch, 4-class RoBERTa classification head.
    N, C = 8, 4
    logits = jax.random.normal(k1, (N, C), dtype=jnp.float32)
    targets = jax.random.randint(k2, (N,), 0, C, dtype=jnp.int32)
    alpha = jnp.linspace(0.5, 1.5, C, dtype=jnp.float32)

    loss = jax.block_until_ready(focal_loss(logits, targets, alpha, gamma=2.0, reduction="mean"))
    ref = _reference(logits, targets, alpha, gamma=2.0, reduction="mean")
    assert jnp.allclose(loss, ref, rtol=1e-5, atol=1e-6), (loss, ref)

    # reduction='sum' path.
    loss_s = jax.block_until_ready(focal_loss(logits, targets, alpha, reduction="sum"))
    ref_s = _reference(logits, targets, alpha, reduction="sum")
    assert jnp.allclose(loss_s, ref_s, rtol=1e-5, atol=1e-6), (loss_s, ref_s)

    # Multi-tile grid with a ragged tail handled in-kernel (no wrapper pad):
    # N=300, tile=128 -> 3 tiles, last block overhangs by 84 masked lanes.
    N2 = 300
    logits2 = jax.random.normal(k3, (N2, C), dtype=jnp.float32)
    targets2 = jax.random.randint(k4, (N2,), 0, C, dtype=jnp.int32)
    loss2 = jax.block_until_ready(focal_loss(logits2, targets2, alpha, tile_n=128))
    ref2 = _reference(logits2, targets2, alpha)
    assert jnp.allclose(loss2, ref2, rtol=1e-5, atol=1e-6), (loss2, ref2)

    # bf16 logits stream (kernel upcasts in-VMEM); same single-tile default path.
    logits2_bf16 = logits2.astype(jnp.bfloat16)
    loss3 = jax.block_until_ready(focal_loss(logits2_bf16, targets2, alpha))
    ref3 = _reference(logits2_bf16, targets2, alpha)
    assert jnp.allclose(loss3, ref3, rtol=5e-3, atol=1e-4), (loss3, ref3)

    print("KERNEL_OK")
</pallas_src>

<mosaic_0001>
module attributes {stable_mosaic.version = 11 : i64} {
  func.func @_focal_loss_kernel(%arg0: i32, %arg1: memref<4x8xf32, #tpu.memory_space<vmem>>, %arg2: memref<1x8xi32, #tpu.memory_space<vmem>>, %arg3: memref<4x1xf32, #tpu.memory_space<vmem>>, %arg4: memref<1x1xf32, #tpu.memory_space<vmem>>) attributes {dimension_semantics = [#tpu.dimension_semantics<arbitrary>], iteration_bounds = array<i64: 1>, scalar_prefetch = 0 : i64, scratch_operands = 0 : i64, tpu.core_type = #tpu.core_type<tc>, window_params = [{transform_indices = @transform_0, window_bounds = array<i64: 4, 8>}, {transform_indices = @transform_1, window_bounds = array<i64: 1, 8>}, {pipeline_mode = #tpu.pipeline_mode<synchronous>, transform_indices = @transform_2, window_bounds = array<i64: 4, 1>}, {pipeline_mode = #tpu.pipeline_mode<synchronous>, transform_indices = @transform_3, window_bounds = array<i64: 1, 1>}]} {
    %c0_i32 = arith.constant 0 : i32
    %0 = arith.cmpi eq, %arg0, %c0_i32 : i32
    %1 = arith.extui %0 : i1 to i32
    %c0_i32_0 = arith.constant 0 : i32
    %2 = arith.cmpi ne, %1, %c0_i32_0 : i32
    scf.if %2 {
      %cst_21 = arith.constant 0.000000e+00 : f32
      %50 = vector.broadcast %cst_21 : f32 to vector<1x1xf32>
      %c0_22 = arith.constant 0 : index
      %c0_23 = arith.constant 0 : index
      %51 = vector.load %arg4[%c0_22, %c0_23] : memref<1x1xf32, #tpu.memory_space<vmem>>, vector<1x1xf32>
      tpu.vector_store %arg4[%c0_22, %c0_23], %50 {strides = array<i32>} : memref<1x1xf32, #tpu.memory_space<vmem>>, vector<1x1xf32>,
    } else {
    }
    %c0 = arith.constant 0 : index
    %c0_1 = arith.constant 0 : index
    %3 = vector.load %arg1[%c0, %c0_1] : memref<4x8xf32, #tpu.memory_space<vmem>>, vector<4x8xf32>
    %c0_2 = arith.constant 0 : index
    %c0_3 = arith.constant 0 : index
    %4 = vector.load %arg2[%c0_2, %c0_3] : memref<1x8xi32, #tpu.memory_space<vmem>>, vector<1x8xi32>
    %c0_4 = arith.constant 0 : index
    %c0_5 = arith.constant 0 : index
    %5 = vector.load %arg3[%c0_4, %c0_5] : memref<4x1xf32, #tpu.memory_space<vmem>>, vector<4x1xf32>
    %cst = arith.constant 0.000000e+00 : f32
    %6 = vector.broadcast %cst : f32 to vector<4x1xf32>
    %7 = arith.subf %6, %5 : vector<4x1xf32>
    %cst_6 = arith.constant dense<0xFF800000> : vector<8xf32>
    %8 = vector.multi_reduction <maximumf>, %3, %cst_6 [0] : vector<4x8xf32> to vector<8xf32>
    %9 = vector.shape_cast %8 : vector<8xf32> to vector<1x8xf32>
    %10 = vector.broadcast %9 : vector<1x8xf32> to vector<4x8xf32>
    %11 = arith.subf %3, %10 : vector<4x8xf32>
    %12 = math.exp %11 : vector<4x8xf32>
    %cst_7 = arith.constant dense<0.000000e+00> : vector<8xf32>
    %13 = vector.multi_reduction <add>, %12, %cst_7 [0] : vector<4x8xf32> to vector<8xf32>
    %14 = vector.shape_cast %13 : vector<8xf32> to vector<1x8xf32>
    %15 = math.log %14 : vector<1x8xf32>
    %16 = vector.broadcast %15 : vector<1x8xf32> to vector<4x8xf32>
    %17 = arith.subf %11, %16 : vector<4x8xf32>
    %18 = tpu.iota {dimensions = array<i32: 0>} : vector<4x8xi32>
    %19 = vector.broadcast %4 : vector<1x8xi32> to vector<4x8xi32>
    %20 = arith.cmpi eq, %18, %19 : vector<4x8xi32>
    %21 = vector.broadcast %7 : vector<4x1xf32> to vector<4x8xf32>
    %22 = arith.mulf %21, %17 : vector<4x8xf32>
    %cst_8 = arith.constant 0.000000e+00 : f32
    %23 = vector.broadcast %cst_8 : f32 to vector<4x8xf32>
    %24 = arith.select %20, %22, %23 : vector<4x8xi1>, vector<4x8xf32>
    %cst_9 = arith.constant dense<0.000000e+00> : vector<8xf32>
    %25 = vector.multi_reduction <add>, %24, %cst_9 [0] : vector<4x8xf32> to vector<8xf32>
    %26 = vector.shape_cast %25 : vector<8xf32> to vector<1x8xf32>
    %cst_10 = arith.constant 0.000000e+00 : f32
    %27 = vector.broadcast %cst_10 : f32 to vector<1x8xf32>
    %28 = arith.subf %27, %26 : vector<1x8xf32>
    %29 = math.exp %28 : vector<1x8xf32>
    %cst_11 = arith.constant 1.000000e+00 : f32
    %30 = vector.broadcast %cst_11 : f32 to vector<1x8xf32>
    %31 = arith.subf %30, %29 : vector<1x8xf32>
    %32 = arith.mulf %31, %31 : vector<1x8xf32>
    %33 = arith.mulf %32, %26 : vector<1x8xf32>
    %34 = tpu.iota {dimensions = array<i32: 1>} : vector<1x8xi32>
    %c8_i32 = arith.constant 8 : i32
    %35 = arith.muli %arg0, %c8_i32 : i32
    %36 = vector.broadcast %35 : i32 to vector<1x8xi32>
    %37 = arith.addi %36, %34 : vector<1x8xi32>
    %c8_i32_12 = arith.constant 8 : i32
    %38 = vector.broadcast %c8_i32_12 : i32 to vector<1x8xi32>
    %39 = arith.cmpi slt, %37, %38 : vector<1x8xi32>
    %cst_13 = arith.constant 0.000000e+00 : f32
    %40 = vector.broadcast %cst_13 : f32 to vector<1x8xf32>
    %41 = arith.select %39, %33, %40 : vector<1x8xi1>, vector<1x8xf32>
    %c0_14 = arith.constant 0 : index
    %c0_15 = arith.constant 0 : index
    %42 = vector.load %arg4[%c0_14, %c0_15] : memref<1x1xf32, #tpu.memory_space<vmem>>, vector<1x1xf32>
    %cst_16 = arith.constant dense<0.000000e+00> : vector<1xf32>
    %43 = vector.multi_reduction <add>, %41, %cst_16 [1] : vector<1x8xf32> to vector<1xf32>
    %44 = vector.shape_cast %43 : vector<1xf32> to vector<1x1xf32>
    %45 = arith.addf %42, %44 : vector<1x1xf32>
    %c0_17 = arith.constant 0 : index
    %c0_18 = arith.constant 0 : index
    %46 = vector.load %arg4[%c0_17, %c0_18] : memref<1x1xf32, #tpu.memory_space<vmem>>, vector<1x1xf32>
    tpu.vector_store %arg4[%c0_17, %c0_18], %45 {strides = array<i32>} : memref<1x1xf32, #tpu.memory_space<vmem>>, vector<1x1xf32>,
    %c0_i32_19 = arith.constant 0 : i32
    %47 = arith.cmpi eq, %arg0, %c0_i32_19 : i32
    %48 = arith.extui %47 : i1 to i32
    %c0_i32_20 = arith.constant 0 : i32
    %49 = arith.cmpi ne, %48, %c0_i32_20 : i32
    scf.if %49 {
      %c0_21 = arith.constant 0 : index
      %c0_22 = arith.constant 0 : index
      %50 = vector.load %arg4[%c0_21, %c0_22] : memref<1x1xf32, #tpu.memory_space<vmem>>, vector<1x1xf32>
      %cst_23 = arith.constant 1.250000e-01 : f32
      %51 = vector.broadcast %cst_23 : f32 to vector<1x1xf32>
      %52 = arith.mulf %50, %51 : vector<1x1xf32>
      %c0_24 = arith.constant 0 : index
      %c0_25 = arith.constant 0 : index
      %53 = vector.load %arg4[%c0_24, %c0_25] : memref<1x1xf32, #tpu.memory_space<vmem>>, vector<1x1xf32>
      tpu.vector_store %arg4[%c0_24, %c0_25], %52 {strides = array<i32>} : memref<1x1xf32, #tpu.memory_space<vmem>>, vector<1x1xf32>,
    } else {
    }
    return
  }
  func.func @transform_0(%arg0: i32) -> (i32, i32) {
    %c0_i32 = arith.constant 0 : i32
    %c0_i32_0 = arith.constant 0 : i32
    return %c0_i32, %arg0 : i32, i32
  }
  func.func @transform_1(%arg0: i32) -> (i32, i32) {
    %c0_i32 = arith.constant 0 : i32
    %c0_i32_0 = arith.constant 0 : i32
    return %c0_i32, %arg0 : i32, i32
  }
  func.func @transform_2(%arg0: i32) -> (i32, i32) {
    %c0_i32 = arith.constant 0 : i32
    %c0_i32_0 = arith.constant 0 : i32
    %c0_i32_1 = arith.constant 0 : i32
    return %c0_i32, %c0_i32_0 : i32, i32
  }
  func.func @transform_3(%arg0: i32) -> (i32, i32) {
    %c0_i32 = arith.constant 0 : i32
    %c0_i32_0 = arith.constant 0 : i32
    %c0_i32_1 = arith.constant 0 : i32
    return %c0_i32, %c0_i32_0 : i32, i32
  }
}

</mosaic_0001>

<bundles_post_ra>
// kernel: tpu_custom_call.1
= control target key start
LH: loop header
LB: loop body
LE: loop exit
PB: predicated region body
PF: predicated region fallthrough
CT: control target
= control target key end

     0   :  { %v143_v1 = vmov 0   ;;  %s190_s0 = inlined_call_operand.vmem [shape: f32[4,8], index: 0, kind: input, shape index: {}]   ;;  %s191_s1 = inlined_call_operand.vmem [shape: s32[1,8], index: 1, kind: input, shape index: {}]   ;;  %s192_s2 = inlined_call_operand.vmem [shape: f32[4,1], index: 2, kind: input, shape index: {}]   ;;  %s193_s3 = inlined_call_operand.hbm [shape: f32[1,1], index: 3, kind: output, shape index: {}]  }
   0x1   :  { %v23_v0 = vld [vmem:[%s192_s2] sm:$0xf]  ;;  %112 = vset.pattern.permute.xlu0 %v143_v1 }
   0x2   :  { %v24_v2 = vsub.f32 0.0, %v23_v0 }
   0x3   :  { %8 = vsyncpa [#allocation3], 0  ;;  %vm25_vm0 = vcmask 60416   ;;  %v21_v3 = vld [vmem:[%s190_s0] sm:$0xf]  ;;  %v46_v22 = vlaneseq  ;;  %vm81_vm3 = vcmask 64512  }
   0x4   :  { %55 = vperm.xlu0 %112, %v24_v2   ;;  %v26_v4 = vsel %vm25_vm0, %v21_v3, -inf  ;;  %v108_v25 = vld [vmem:[%s191_s1] ss:$0 sm:$0xff]  ;;  %vm19_vm4 = vcmask 0   ;;  %v144_v46 = vmov 0.0   ;;  %s145_s1 = smov [#allocation2]  }
   0x5   :  { %v27_v5 = vrot.slane %v26_v4, 4  ;;  %v47_v24 = vshrl.u32 %v46_v22, 7  ;;  %v74_v40 = vand.u32 127, %v46_v22  ;;  %20 = vst.msk [vmem:[#allocation2] sm:$0x1] %vm19_vm4, %v144_v46  ;;  %s100_s16 = sshll.u32 %s145_s1, 4  ;;  %s101_s16 = int_to_ptr.vmem [resolvable:$true] %s100_s16 }
   0x6   :  { %s119_s17 = scalar_lea.vmem %s101_s16, 16  ;;  %s123_s18 = scalar_lea.vmem %s101_s16, 32 }
   0x7   :  { %v28_v6 = vmax.f32 %v26_v4, %v27_v5  ;;  %vm52_vm1 = vcmp.eq.s32.totalorder %v47_v24, %v108_v25  ;;  %vm78_vm2 = vcmp.lt.s32.totalorder %v74_v40, 8  ;;  %p120_p0 = scmp.ne.s32.totalorder %s101_s16, %s119_s17  ;;  %p124_p1 = scmp.lt.s32.totalorder %s101_s16, %s101_s16 }
   0x8   :  { %p125_p2 = scmp.lt.s32.totalorder %s123_s18, %s119_s17 }
   0x9   :  { %v29_v7 = vrot.slane %v28_v6, 2 }
   0xa   :  { %p126_p3 = por %p125_p2, %p124_p1 }
   0xb   :  { %v30_v8 = vmax.f32 %v28_v6, %v29_v7 }
   0xc   :  { %v80_v47 = vld [vmem:[#allocation2] sm:$0x1]  ;;  %p127_p4 = pnand %p126_p3, %p120_p0 }
   0xd   :  { %v31_v9 = vrot.slane %v30_v8, 1 }
   0xf   :  { %v32_v10 = vmax.f32 %v30_v8, %v31_v9 }
  0x11   :  { %v33_v11 = vsub.f32 %v21_v3, %v32_v10 }
  0x13   :  { %v34_v12 = vmul.f32 1.442695, %v33_v11 }
  0x15   :  { %113 = vpow2.f32 %v34_v12 }
  0x1f   :  { %v114_v13 = vpop.eup %113 }
  0x20   :  { %v36_v14 = vsel %vm25_vm0, %v114_v13, 0.0 }
  0x21   :  { %v37_v15 = vrot.slane %v36_v14, 4 }
  0x23   :  { %v38_v16 = vadd.f32 %v37_v15, %v36_v14 }
  0x25   :  { %v39_v17 = vrot.slane %v38_v16, 2 }
  0x27   :  { %v40_v18 = vadd.f32 %v39_v17, %v38_v16 }
  0x29   :  { %v41_v19 = vrot.slane %v40_v18, 1 }
  0x2b   :  { %v42_v20 = vadd.f32 %v41_v19, %v40_v18 }
  0x2d   :  { %115 = vlog2.f32 %v42_v20 }
  0x37   :  { %v116_v21 = vpop.eup %115 }
  0x38   :  { %v44_v23 = vmul.f32 0.6931472, %v116_v21 }
  0x3a   :  { %v45_v26 = vsub.f32 %v33_v11, %v44_v23 }
  0x83   :  { %v56_v27 = vpop.permute.xlu0 %55 }
  0x84   :  { %v58_v28 = vmul.f32 %v56_v27, %v45_v26 }
  0x86   :  { %v59_v29 = vsel %vm52_vm1, %v58_v28, 0.0 }
  0x87   :  { %v60_v30 = vsel %vm25_vm0, %v59_v29, 0.0 }
  0x88   :  { %v61_v31 = vrot.slane %v60_v30, 4 }
  0x8a   :  { %v62_v32 = vadd.f32 %v61_v31, %v60_v30 }
  0x8c   :  { %v63_v33 = vrot.slane %v62_v32, 2 }
  0x8e   :  { %v64_v34 = vadd.f32 %v63_v33, %v62_v32 }
  0x90   :  { %v65_v35 = vrot.slane %v64_v34, 1 }
  0x92   :  { %v66_v36 = vadd.f32 %v65_v35, %v64_v34 }
  0x94   :  { %v67_v37 = vsub.f32 0.0, %v66_v36 }
  0x96   :  { %v68_v38 = vmul.f32 1.442695, %v67_v37 }
  0x98   :  { %117 = vpow2.f32 %v68_v38 }
  0xa2   :  { %v118_v39 = vpop.eup %117 }
  0xa3   :  { %v70_v41 = vsub.f32 1.0, %v118_v39 }
  0xa5   :  { %v71_v42 = vmul.f32 %v70_v41, %v70_v41 }
  0xa7   :  { %v72_v43 = vmul.f32 %v71_v42, %v66_v36 }
  0xa9   :  { %v79_v44 = vsel %vm78_vm2, %v72_v43, 0.0 }
  0xaa   :  { %v82_v45 = vsel %vm81_vm3, %v79_v44, 0.0 }
  0xab   :  { %83 = vadd.xlane.f32.xlu0 %v82_v45 }
 0x138   :  { %v84_v48 = vpop.xlane.xlu0 %83 }
 0x139   :  { %v85_v49 = vadd.f32 %v84_v48, %v80_v47 }
 0x13b   :  { %87 = vst.msk [vmem:[#allocation2] sm:$0x1] %vm19_vm4, %v85_v49 }
 0x142   :  { %v91_v50 = vld [vmem:[#allocation2] sm:$0x1] }
 0x143   :  { %v92_v51 = vmul.f32 0.125, %v91_v50 }
 0x145   :  { %93 = vst.msk [vmem:[#allocation2] sm:$0x1] %vm19_vm4, %v92_v51 }
 0x146   :  { %130 = shalt.err (!%p127_p4)
}
 0x147   :  { %s131_s21 = scalar_lea.hbm %s193_s3, 16 }
 0x148   :  { %p132_p5 = scmp.ne.s32.totalorder %s193_s3, %s131_s21  ;;  %p135_p6 = scmp.lt.u32.totalorder %s131_s21, %s193_s3 }
 0x14a   :  { %p137_p7 = pnand %p135_p6, %p132_p5 }
 0x14c   :  { %140 = shalt.err (!%p137_p7)
}
 0x14d   :  { %103 = dma.vmem_to_hbm [thread:$0]  %s101_s16, 16, %s193_s3, [#allocation3]  }
 0x14e   :  { %141 = dma.done.wait [#allocation3], 16  }
 0x14f   :  { %142 = vsyncadd [#allocation3], 4294967280 }
 0x150   :  { %107 = vsyncpa [#allocation3], 1 }

</bundles_post_ra>
